<compile_context>
chip_gen: v7x
topology: tpu7x:2x2x1
jax: 0.10.0
libtpu: 0.0.40
codegen_flags: <defaults>
</compile_context>

<pallas_src>
import math

import jax
import jax.numpy as jnp
from jax.experimental import pallas as pl
from jax.experimental.pallas import tpu as pltpu


def _round_up(x, m):
    return ((x + m - 1) // m) * m


def critic_kernel(x_ref, w1_ref, b1_ref, w2_ref, b2_ref, w3_ref, b3_ref, o_ref):
    # Cast matmul operands to bf16 for the MXU; accumulate in f32.
    xb = x_ref[...].astype(jnp.bfloat16)

    # Layer 1: sigmoid(x @ W1 + b1)   (bias + sigmoid in f32 on the VPU/EUP)
    h1 = jnp.dot(xb, w1_ref[...].astype(jnp.bfloat16),
                 preferred_element_type=jnp.float32)
    h1 = jax.nn.sigmoid(h1 + b1_ref[...])

    # Layer 2: sigmoid(h1 @ W2 + b2)
    h2 = jnp.dot(h1.astype(jnp.bfloat16), w2_ref[...].astype(jnp.bfloat16),
                 preferred_element_type=jnp.float32)
    h2 = jax.nn.sigmoid(h2 + b2_ref[...])

    # Layer 3: h2 @ W3 + b3  (no activation)
    out = jnp.dot(h2.astype(jnp.bfloat16), w3_ref[...].astype(jnp.bfloat16),
                  preferred_element_type=jnp.float32)
    o_ref[...] = (out + b3_ref[...]).astype(o_ref.dtype)


def critic_forward(x, params, *, block_batch=512):
    """x: [B, input_size] float32. params: dict of pre-transposed weights/biases."""
    w1, b1, w2, b2, w3, b3 = (
        params["w1"], params["b1"], params["w2"],
        params["b2"], params["w3"], params["b3"],
    )
    B, F = x.shape
    H = w1.shape[1]
    O = w3.shape[1]

    # Batch tile: multiple of 8 sublanes, capped at block_batch.
    TB = min(_round_up(block_batch, 8), _round_up(B, 8))
    B_pad = _round_up(B, TB)
    if B_pad != B:
        x = jnp.pad(x, ((0, B_pad - B), (0, 0)))
    grid = (B_pad // TB,)

    flops = 2 * B_pad * (F * H + H * H + H * O)
    transcendentals = 2 * B_pad * H  # two sigmoid layers
    bytes_accessed = (
        B_pad * F * 4                      # x read
        + (F * H + H * H + H * O) * 4      # weights (resident, counted once)
        + (2 * H + O) * 4                  # biases
        + B_pad * O * 4                    # output write
    )

    grid_spec = pltpu.PrefetchScalarGridSpec(
        num_scalar_prefetch=0,
        grid=grid,
        in_specs=[
            pl.BlockSpec((TB, F), lambda i: (i, 0)),   # x: tiled over batch
            pl.BlockSpec((F, H), lambda i: (0, 0)),    # w1: resident
            pl.BlockSpec((1, H), lambda i: (0, 0)),    # b1
            pl.BlockSpec((H, H), lambda i: (0, 0)),    # w2
            pl.BlockSpec((1, H), lambda i: (0, 0)),    # b2
            pl.BlockSpec((H, O), lambda i: (0, 0)),    # w3
            pl.BlockSpec((1, O), lambda i: (0, 0)),    # b3
        ],
        out_specs=pl.BlockSpec((TB, O), lambda i: (i, 0)),
    )

    out = pl.pallas_call(
        critic_kernel,
        out_shape=jax.ShapeDtypeStruct((B_pad, O), jnp.float32),
        grid_spec=grid_spec,
        compiler_params=pltpu.CompilerParams(
            dimension_semantics=("parallel",),
        ),
        cost_estimate=pl.CostEstimate(
            flops=flops,
            transcendentals=transcendentals,
            bytes_accessed=bytes_accessed,
        ),
    )(x, w1, b1, w2, b2, w3, b3)

    return out[:B]


def init_linear(key, in_features, out_features):
    """Deterministic init mirroring nn.Linear defaults (uniform +/- 1/sqrt(fan_in)).
    Returns (W_transposed [in, out], b [1, out])."""
    kw, kb = jax.random.split(key)
    bound = 1.0 / math.sqrt(in_features)
    w = jax.random.uniform(kw, (in_features, out_features),
                           minval=-bound, maxval=bound, dtype=jnp.float32)
    b = jax.random.uniform(kb, (1, out_features),
                           minval=-bound, maxval=bound, dtype=jnp.float32)
    return w, b


def reference_forward(x, params):
    h = jax.nn.sigmoid(x @ params["w1"] + params["b1"])
    h = jax.nn.sigmoid(h @ params["w2"] + params["b2"])
    return h @ params["w3"] + params["b3"]


if __name__ == "__main__":
    # Small shapes consistent with the module's forward.
    batch, input_size, hidden_size, output_size = 8, 16, 32, 4

    key = jax.random.PRNGKey(0)
    kx, k1, k2, k3, kx2 = jax.random.split(key, 5)

    w1, b1 = init_linear(k1, input_size, hidden_size)
    w2, b2 = init_linear(k2, hidden_size, hidden_size)
    w3, b3 = init_linear(k3, hidden_size, output_size)
    params = {"w1": w1, "b1": b1, "w2": w2, "b2": b2, "w3": w3, "b3": b3}

    # Case 1: toy batch (single grid step).
    x = jax.random.normal(kx, (batch, input_size), dtype=jnp.float32)
    out = jax.block_until_ready(critic_forward(x, params))
    ref = reference_forward(x, params)
    assert out.shape == (batch, output_size)
    # bf16 matmul operands vs f32 reference -> ~1e-2 tolerance.
    assert jnp.allclose(out, ref, atol=2e-2, rtol=2e-2)

    # Case 2: batch not a multiple of the tile, multiple grid steps (pad path).
    x2 = jax.random.normal(kx2, (200, input_size), dtype=jnp.float32)
    out2 = jax.block_until_ready(critic_forward(x2, params, block_batch=64))
    ref2 = reference_forward(x2, params)
    assert out2.shape == (200, output_size)
    assert jnp.allclose(out2, ref2, atol=2e-2, rtol=2e-2)

    print("KERNEL_OK")
</pallas_src>

<mosaic_0001>
module attributes {stable_mosaic.version = 11 : i64} {
  func.func @critic_kernel(%arg0: i32, %arg1: memref<8x16xf32, #tpu.memory_space<vmem>>, %arg2: memref<16x32xf32, #tpu.memory_space<vmem>>, %arg3: memref<1x32xf32, #tpu.memory_space<vmem>>, %arg4: memref<32x32xf32, #tpu.memory_space<vmem>>, %arg5: memref<1x32xf32, #tpu.memory_space<vmem>>, %arg6: memref<32x4xf32, #tpu.memory_space<vmem>>, %arg7: memref<1x4xf32, #tpu.memory_space<vmem>>, %arg8: memref<8x4xf32, #tpu.memory_space<vmem>>) attributes {dimension_semantics = [#tpu.dimension_semantics<parallel>], iteration_bounds = array<i64: 1>, scalar_prefetch = 0 : i64, scratch_operands = 0 : i64, tpu.core_type = #tpu.core_type<tc>, window_params = [{transform_indices = @transform_0, window_bounds = array<i64: 8, 16>}, {pipeline_mode = #tpu.pipeline_mode<synchronous>, transform_indices = @transform_1, window_bounds = array<i64: 16, 32>}, {pipeline_mode = #tpu.pipeline_mode<synchronous>, transform_indices = @transform_2, window_bounds = array<i64: 1, 32>}, {pipeline_mode = #tpu.pipeline_mode<synchronous>, transform_indices = @transform_3, window_bounds = array<i64: 32, 32>}, {pipeline_mode = #tpu.pipeline_mode<synchronous>, transform_indices = @transform_4, window_bounds = array<i64: 1, 32>}, {pipeline_mode = #tpu.pipeline_mode<synchronous>, transform_indices = @transform_5, window_bounds = array<i64: 32, 4>}, {pipeline_mode = #tpu.pipeline_mode<synchronous>, transform_indices = @transform_6, window_bounds = array<i64: 1, 4>}, {transform_indices = @transform_7, window_bounds = array<i64: 8, 4>}]} {
    %c0 = arith.constant 0 : index
    %c0_0 = arith.constant 0 : index
    %0 = vector.load %arg1[%c0, %c0_0] : memref<8x16xf32, #tpu.memory_space<vmem>>, vector<8x16xf32>
    %1 = arith.truncf %0 : vector<8x16xf32> to vector<8x16xbf16>
    %c0_1 = arith.constant 0 : index
    %c0_2 = arith.constant 0 : index
    %2 = vector.load %arg2[%c0_1, %c0_2] : memref<16x32xf32, #tpu.memory_space<vmem>>, vector<16x32xf32>
    %3 = arith.truncf %2 : vector<16x32xf32> to vector<16x32xbf16>
    %cst = arith.constant dense<0.000000e+00> : vector<8x32xf32>
    %4 = tpu.matmul %1, %3, %cst {dimension_numbers = #tpu.dot_dimension_numbers<[1], [0], [0], [1], [0, 0, 1, 1], [], []>} : vector<8x16xbf16>, vector<16x32xbf16>, vector<8x32xf32> -> vector<8x32xf32>
    %c0_3 = arith.constant 0 : index
    %c0_4 = arith.constant 0 : index
    %5 = vector.load %arg3[%c0_3, %c0_4] : memref<1x32xf32, #tpu.memory_space<vmem>>, vector<1x32xf32>
    %6 = vector.broadcast %5 : vector<1x32xf32> to vector<8x32xf32>
    %7 = arith.addf %4, %6 : vector<8x32xf32>
    %8 = arith.negf %7 : vector<8x32xf32>
    %9 = math.exp %8 : vector<8x32xf32>
    %cst_5 = arith.constant 1.000000e+00 : f32
    %10 = vector.broadcast %cst_5 : f32 to vector<8x32xf32>
    %11 = arith.addf %10, %9 : vector<8x32xf32>
    %12 = arith.divf %10, %11 : vector<8x32xf32>
    %13 = arith.truncf %12 : vector<8x32xf32> to vector<8x32xbf16>
    %c0_6 = arith.constant 0 : index
    %c0_7 = arith.constant 0 : index
    %14 = vector.load %arg4[%c0_6, %c0_7] : memref<32x32xf32, #tpu.memory_space<vmem>>, vector<32x32xf32>
    %15 = arith.truncf %14 : vector<32x32xf32> to vector<32x32xbf16>
    %cst_8 = arith.constant dense<0.000000e+00> : vector<8x32xf32>
    %16 = tpu.matmul %13, %15, %cst_8 {dimension_numbers = #tpu.dot_dimension_numbers<[1], [0], [0], [1], [0, 0, 1, 1], [], []>} : vector<8x32xbf16>, vector<32x32xbf16>, vector<8x32xf32> -> vector<8x32xf32>
    %c0_9 = arith.constant 0 : index
    %c0_10 = arith.constant 0 : index
    %17 = vector.load %arg5[%c0_9, %c0_10] : memref<1x32xf32, #tpu.memory_space<vmem>>, vector<1x32xf32>
    %18 = vector.broadcast %17 : vector<1x32xf32> to vector<8x32xf32>
    %19 = arith.addf %16, %18 : vector<8x32xf32>
    %20 = arith.negf %19 : vector<8x32xf32>
    %21 = math.exp %20 : vector<8x32xf32>
    %cst_11 = arith.constant 1.000000e+00 : f32
    %22 = vector.broadcast %cst_11 : f32 to vector<8x32xf32>
    %23 = arith.addf %22, %21 : vector<8x32xf32>
    %24 = arith.divf %22, %23 : vector<8x32xf32>
    %25 = arith.truncf %24 : vector<8x32xf32> to vector<8x32xbf16>
    %c0_12 = arith.constant 0 : index
    %c0_13 = arith.constant 0 : index
    %26 = vector.load %arg6[%c0_12, %c0_13] : memref<32x4xf32, #tpu.memory_space<vmem>>, vector<32x4xf32>
    %27 = arith.truncf %26 : vector<32x4xf32> to vector<32x4xbf16>
    %cst_14 = arith.constant dense<0.000000e+00> : vector<8x4xf32>
    %28 = tpu.matmul %25, %27, %cst_14 {dimension_numbers = #tpu.dot_dimension_numbers<[1], [0], [0], [1], [0, 0, 1, 1], [], []>} : vector<8x32xbf16>, vector<32x4xbf16>, vector<8x4xf32> -> vector<8x4xf32>
    %c0_15 = arith.constant 0 : index
    %c0_16 = arith.constant 0 : index
    %29 = vector.load %arg7[%c0_15, %c0_16] : memref<1x4xf32, #tpu.memory_space<vmem>>, vector<1x4xf32>
    %30 = vector.broadcast %29 : vector<1x4xf32> to vector<8x4xf32>
    %31 = arith.addf %28, %30 : vector<8x4xf32>
    %c0_17 = arith.constant 0 : index
    %c0_18 = arith.constant 0 : index
    %32 = vector.load %arg8[%c0_17, %c0_18] : memref<8x4xf32, #tpu.memory_space<vmem>>, vector<8x4xf32>
    tpu.vector_store %arg8[%c0_17, %c0_18], %31 {strides = array<i32>} : memref<8x4xf32, #tpu.memory_space<vmem>>, vector<8x4xf32>,
    return
  }
  func.func @transform_0(%arg0: i32) -> (i32, i32) {
    %c0_i32 = arith.constant 0 : i32
    %c0_i32_0 = arith.constant 0 : i32
    return %arg0, %c0_i32 : i32, i32
  }
  func.func @transform_1(%arg0: i32) -> (i32, i32) {
    %c0_i32 = arith.constant 0 : i32
    %c0_i32_0 = arith.constant 0 : i32
    %c0_i32_1 = arith.constant 0 : i32
    return %c0_i32, %c0_i32_0 : i32, i32
  }
  func.func @transform_2(%arg0: i32) -> (i32, i32) {
    %c0_i32 = arith.constant 0 : i32
    %c0_i32_0 = arith.constant 0 : i32
    %c0_i32_1 = arith.constant 0 : i32
    return %c0_i32, %c0_i32_0 : i32, i32
  }
  func.func @transform_3(%arg0: i32) -> (i32, i32) {
    %c0_i32 = arith.constant 0 : i32
    %c0_i32_0 = arith.constant 0 : i32
    %c0_i32_1 = arith.constant 0 : i32
    return %c0_i32, %c0_i32_0 : i32, i32
  }
  func.func @transform_4(%arg0: i32) -> (i32, i32) {
    %c0_i32 = arith.constant 0 : i32
    %c0_i32_0 = arith.constant 0 : i32
    %c0_i32_1 = arith.constant 0 : i32
    return %c0_i32, %c0_i32_0 : i32, i32
  }
  func.func @transform_5(%arg0: i32) -> (i32, i32) {
    %c0_i32 = arith.constant 0 : i32
    %c0_i32_0 = arith.constant 0 : i32
    %c0_i32_1 = arith.constant 0 : i32
    return %c0_i32, %c0_i32_0 : i32, i32
  }
  func.func @transform_6(%arg0: i32) -> (i32, i32) {
    %c0_i32 = arith.constant 0 : i32
    %c0_i32_0 = arith.constant 0 : i32
    %c0_i32_1 = arith.constant 0 : i32
    return %c0_i32, %c0_i32_0 : i32, i32
  }
  func.func @transform_7(%arg0: i32) -> (i32, i32) {
    %c0_i32 = arith.constant 0 : i32
    %c0_i32_0 = arith.constant 0 : i32
    return %arg0, %c0_i32 : i32, i32
  }
}

</mosaic_0001>

<bundles_post_ra>
// kernel: tpu_custom_call.1
= control target key start
LH: loop header
LB: loop body
LE: loop exit
PB: predicated region body
PF: predicated region fallthrough
CT: control target
= control target key end

     0   :  { %12 = vsyncpa [#allocation3], 0  ;;  %s306_s24 = smov [#allocation2]   ;;  %s404_s0 = inlined_call_operand.vmem [shape: f32[8,16], index: 0, kind: input, shape index: {}]   ;;  %s405_s1 = inlined_call_operand.hbm [shape: f32[16,32], index: 1, kind: input, shape index: {}]   ;;  %s406_s2 = inlined_call_operand.vmem [shape: f32[1,32], index: 2, kind: input, shape index: {}]   ;;  %s407_s3 = inlined_call_operand.vmem [shape: f32[32,32], index: 3, kind: input, shape index: {}]   ;;  %s408_s4 = inlined_call_operand.vmem [shape: f32[1,32], index: 4, kind: input, shape index: {}]   ;;  %s409_s5 = inlined_call_operand.vmem [shape: f32[32,4], index: 5, kind: input, shape index: {}]   ;;  %s410_s6 = inlined_call_operand.vmem [shape: f32[1,4], index: 6, kind: input, shape index: {}]   ;;  %s411_s7 = inlined_call_operand.vmem [shape: f32[8,4], index: 7, kind: output, shape index: {}]  }
   0x1   :  { %s20_s25 = sshll.u32 %s306_s24, 4  ;;  %s282_s28 = scalar_lea.hbm %s405_s1, 256  ;;  %s21_s25 = int_to_ptr.vmem [resolvable:$true] %s20_s25 }
   0x2   :  { %p283_p0 = scmp.ne.s32.totalorder %s405_s1, %s282_s28  ;;  %p286_p1 = scmp.lt.u32.totalorder %s282_s28, %s405_s1 }
   0x4   :  { %p288_p2 = pnand %p286_p1, %p283_p0 }
   0x6   :  { %291 = shalt.err (!%p288_p2)
}
   0x7   :  { %s292_s10 = scalar_lea.vmem %s21_s25, 256  ;;  %p297_p4 = scmp.lt.s32.totalorder %s21_s25, %s21_s25 }
   0x8   :  { %p293_p3 = scmp.ne.s32.totalorder %s21_s25, %s292_s10  ;;  %p298_p5 = scmp.lt.s32.totalorder %s292_s10, %s292_s10 }
   0xa   :  { %p299_p6 = por %p298_p5, %p297_p4 }
   0xc   :  { %p300_p7 = pnand %p299_p6, %p293_p3 }
   0xe   :  { %303 = shalt.err (!%p300_p7)
}
   0xf   :  { %s307_s11 = smov 128   ;;  %s308_s12 = smov 8  }
  0x10   :  { %26 = dma.hbm_to_vmem [thread:$0]  %s405_s1, 256, %s21_s25, [#allocation3], %s307_s11, %s307_s11, %s308_s12  }
  0x11   :  { %304 = dma.done.wait [#allocation3], 256  }
  0x12   :  { %305 = vsyncadd [#allocation3], 4294967040  ;;  %v309_v0 = vmov 0.0   ;;  %vm310_vm0 = vmmov 0   ;;  %v43_v1 = vld [vmem:[#allocation2] sm:$0xff]  ;;  %v44_v2 = vld [vmem:[#allocation2 + $0x8] sm:$0xff] }
  0x13   :  { %247 = vmatprep.subr.bf16.mxu0 %v309_v0  ;;  %249 = vmatprep.mubr.msk.bf16.mxu0 %vm310_vm0, %v309_v0  ;;  %v41_v3 = vld [vmem:[%s404_s0] sm:$0xff]  ;;  %v45_v4 = vpack.c.bf16 %v44_v2, %v43_v1  ;;  %vm53_vm1 = vcmask 130048   ;;  %v105_v7 = vld [vmem:[%s407_s3 + $0x8] sm:$0xff]  ;;  %v106_v8 = vld [vmem:[%s407_s3 + $0x10] sm:$0xff]  ;;  %vm117_vm2 = vcmask 261120   ;;  %vm224_vm3 = vcmask 31744  }
  0x14   :  { %253 = vmatprep.subr.bf16.mxu1 %v309_v0  ;;  %257 = vmatprep.mubr.msk.bf16.mxu1 %vm310_vm0, %v309_v0  ;;  %v42_v5 = vpack.c.bf16 %v41_v3, %v41_v3  ;;  %v104_v6 = vld [vmem:[%s407_s3] sm:$0xff]  ;;  %v107_v10 = vld [vmem:[%s407_s3 + $0x18] sm:$0xff]  ;;  %v169_v24 = vld [vmem:[%s409_s5 + $0x8] sm:$0xff] }
  0x15   :  { %248 = vmatpush3.bf16.msra.mxu0 %v45_v4  ;;  %v108_v9 = vpack.c.bf16 %v105_v7, %v104_v6  ;;  %v109_v11 = vpack.c.bf16 %v107_v10, %v106_v8  ;;  %v231_v12 = vld [vmem:[%s406_s2] ss:$0 sm:$0xff]  ;;  %v170_v26 = vld [vmem:[%s409_s5 + $0x10] sm:$0xff]  ;;  %v171_v27 = vld [vmem:[%s409_s5 + $0x18] sm:$0xff] }
  0x16   :  { %261 = vmatprep.subr.bf16.mxu0 %v309_v0  ;;  %v168_v23 = vld [vmem:[%s409_s5] sm:$0xff]  ;;  %v173_v28 = vpack.c.bf16 %v171_v27, %v170_v26 }
  0x17   :  { %254 = vmatpush3.bf16.msra.mxu1 %v108_v9  ;;  %v172_v25 = vpack.c.bf16 %v169_v24, %v168_v23  ;;  %v234_v29 = vld [vmem:[%s408_s4] ss:$0 sm:$0xff] }
  0x18   :  { %250 = vmatmul.mubr.msk.bf16.vlgmr.msra.gmra.mrb[0].mxu0 %vm53_vm1, %v42_v5  ;;  %255 = vmatprep.subr.bf16.mxu1 %v309_v0  ;;  %v237_v40 = vld [vmem:[%s410_s6] ss:$0 sm:$0xff] }
  0x19   :  { %265 = vmatprep.mubr.msk.bf16.mxu0 %vm310_vm0, %v309_v0  ;;  %262 = vmatpush3.bf16.msra.mxu0 %v172_v25 }
  0x1a   :  { %263 = vmatprep.subr.bf16.mxu0 %v309_v0 }
  0x1b   :  { %256 = vmatpush3.bf16.msra.mxu1 %v109_v11 }
  0x1d   :  { %264 = vmatpush3.bf16.msra.mxu0 %v173_v28 }
  0xeb   :  { %v91_v13 = vpop.f32.mrb[0].mxu0 }
  0xec   :  { %v92_v14 = vadd.f32 %v231_v12, %v91_v13  ;;  %v251_v15 = vpop.f32.mrb[1].mxu0 }
  0xed   :  { %v94_v16 = vpop.f32.mrb[2].mxu0 }
  0xee   :  { %v233_v17 = vmul.f32 -1.442695, %v92_v14  ;;  %v252_v18 = vpop.f32.mrb[3].mxu0 }
  0xf0   :  { %274 = vpow2.f32 %v233_v17 }
  0xfa   :  { %v275_v19 = vpop.eup %274 }
  0xfb   :  { %v100_v20 = vadd.f32 1.0, %v275_v19 }
  0xfd   :  { %276 = vrcp.f32 %v100_v20 }
 0x107   :  { %v277_v21 = vpop.eup %276 }
 0x108   :  { %v103_v22 = vpack.c.bf16 %v277_v21, %v277_v21 }
 0x10a   :  { %258 = vmatmul.mubr.msk.bf16.vlgmr.msra.gmra.mrb[0].mxu1 %vm117_vm2, %v103_v22 }
 0x1dd   :  { %v155_v30 = vpop.f32.mrb[0].mxu1 }
 0x1de   :  { %v156_v31 = vadd.f32 %v234_v29, %v155_v30  ;;  %v259_v32 = vpop.f32.mrb[1].mxu1 }
 0x1df   :  { %v158_v33 = vpop.f32.mrb[2].mxu1 }
 0x1e0   :  { %v236_v34 = vmul.f32 -1.442695, %v156_v31  ;;  %v260_v35 = vpop.f32.mrb[3].mxu1 }
 0x1e2   :  { %278 = vpow2.f32 %v236_v34 }
 0x1ec   :  { %v279_v36 = vpop.eup %278 }
 0x1ed   :  { %v164_v37 = vadd.f32 1.0, %v279_v36 }
 0x1ef   :  { %280 = vrcp.f32 %v164_v37 }
 0x1f9   :  { %v281_v38 = vpop.eup %280 }
 0x1fa   :  { %v167_v39 = vpack.c.bf16 %v281_v38, %v281_v38 }
 0x1fc   :  { %266 = vmatmul.mubr.msk.bf16.vlgmr.msra.gmra.mrb[4].mxu0 %vm117_vm2, %v167_v39 }
 0x2cf   :  { %v218_v41 = vpop.f32.mrb[4].mxu0 }
 0x2d0   :  { %v219_v42 = vadd.f32 %v237_v40, %v218_v41  ;;  %v267_v43 = vpop.f32.mrb[5].mxu0 }
 0x2d1   :  { %v221_v44 = vpop.f32.mrb[6].mxu0 }
 0x2d2   :  { %225 = vst.msk [vmem:[%s411_s7] sm:$0xff] %vm224_vm3, %v219_v42  ;;  %v268_v45 = vpop.f32.mrb[7].mxu0 }
 0x2d3   :  { %230 = vsyncpa [#allocation3], 1 }

</bundles_post_ra>
